<compile_context>
chip_gen: v7x
topology: tpu7x:2x2x1
jax: 0.10.0
libtpu: 0.0.40
codegen_flags: <defaults>
</compile_context>

<pallas_src>
import jax
import jax.numpy as jnp
from jax.experimental import pallas as pl
from jax.experimental.pallas import tpu as pltpu

# Below this many bytes the fixed pallas_call + DMA-setup cost dwarfs the copy;
# just return x (10-100x win for tiny inputs per the review).
_DEFAULT_MIN_KERNEL_BYTES = 1 << 20  # 1 MiB


def _dma_identity_kernel(x_hbm_ref, o_hbm_ref, copy_sem):
    # Whole-array HBM -> HBM copy: one DMA, start + wait. No VMEM staging.
    cp = pltpu.make_async_copy(x_hbm_ref, o_hbm_ref, copy_sem)
    cp.start()
    cp.wait()


def dummy_body_forward(x, *, donate=False):
    """Pallas implementation of DummyBody.forward: out = x (HBM->HBM DMA copy).

    Set donate=True only if the caller actually donates x's buffer; otherwise
    aliasing would force XLA to insert a defensive copy (~2x HBM traffic).
    """
    extra_kwargs = {}
    if donate:
        extra_kwargs["input_output_aliases"] = {0: 0}
    return pl.pallas_call(
        _dma_identity_kernel,
        out_shape=jax.ShapeDtypeStruct(x.shape, x.dtype),
        in_specs=[pl.BlockSpec(memory_space=pl.ANY)],
        out_specs=pl.BlockSpec(memory_space=pl.ANY),
        scratch_shapes=[pltpu.SemaphoreType.DMA(())],
        **extra_kwargs,
    )(x)


class DummyBodyPallas:
    """JAX/Pallas port of DummyBody. No parameters; feature_dim == state_dim."""

    def __init__(self, state_dim, *, use_kernel=True,
                 min_kernel_bytes=_DEFAULT_MIN_KERNEL_BYTES):
        self.feature_dim = state_dim
        self.use_kernel = use_kernel
        self.min_kernel_bytes = min_kernel_bytes

    def __call__(self, x):
        nbytes = x.size * x.dtype.itemsize
        if not self.use_kernel or nbytes < self.min_kernel_bytes:
            # Optimal identity: no kernel launch, no HBM traffic.
            return x
        return dummy_body_forward(x)


if __name__ == "__main__":
    key = jax.random.PRNGKey(0)

    # Small shape consistent with the module (batch of flat state vectors).
    batch, state_dim = 8, 32
    x = jax.random.normal(key, (batch, state_dim), dtype=jnp.float32)

    # 1) Exercise the Pallas DMA kernel directly on the small input.
    out = jax.block_until_ready(dummy_body_forward(x))
    assert out.shape == x.shape and out.dtype == x.dtype
    assert bool(jnp.all(out == x))

    # 2) Module path: tiny input takes the zero-cost return-x fast path.
    body = DummyBodyPallas(state_dim)
    out_fast = jax.block_until_ready(body(x))
    assert bool(jnp.all(out_fast == x))

    # 3) Module path forced through the kernel (threshold 0), on a different
    #    rank/dtype to show the DMA copy is shape/dtype agnostic.
    x4d = jax.random.normal(key, (2, 4, 16, 16), dtype=jnp.bfloat16)
    body_kernel = DummyBodyPallas(state_dim, min_kernel_bytes=0)
    out4d = jax.block_until_ready(body_kernel(x4d))
    assert out4d.shape == x4d.shape and out4d.dtype == x4d.dtype
    assert bool(jnp.all(out4d == x4d))

    print("KERNEL_OK")
</pallas_src>

<mosaic_0001>
module attributes {stable_mosaic.version = 11 : i64} {
  func.func @_dma_identity_kernel(%arg0: memref<8x32xf32, #tpu.memory_space<any>>, %arg1: memref<8x32xf32, #tpu.memory_space<any>>, %arg2: memref<!tpu.dma_semaphore, #tpu.memory_space<semaphore_mem>>) attributes {dimension_semantics = [], scalar_prefetch = 0 : i64, scratch_operands = 1 : i64, tpu.core_type = #tpu.core_type<tc>} {
    tpu.enqueue_dma source(%arg0 : memref<8x32xf32, #tpu.memory_space<any>>) target(%arg1 : memref<8x32xf32, #tpu.memory_space<any>>) target_semaphore(%arg2 : memref<!tpu.dma_semaphore, #tpu.memory_space<semaphore_mem>>)
    tpu.wait_dma2 semaphore(%arg2 : memref<!tpu.dma_semaphore, #tpu.memory_space<semaphore_mem>>) src(%arg0 : memref<8x32xf32, #tpu.memory_space<any>>) dst(%arg1 : memref<8x32xf32, #tpu.memory_space<any>>)
    return
  }
}

</mosaic_0001>

<bundles_post_ra>
// kernel: tpu_custom_call.1
= control target key start
LH: loop header
LB: loop body
LE: loop exit
PB: predicated region body
PF: predicated region fallthrough
CT: control target
= control target key end

     0   :  { %s34_s6 = smov [#allocation2]   ;;  %s35_s7 = smov [#allocation3]   ;;  %s53_s0 = inlined_call_operand.hbm [shape: f32[8,32], index: 0, kind: input, shape index: {}]   ;;  %s54_s1 = inlined_call_operand.hbm [shape: f32[8,32], index: 1, kind: output, shape index: {}]  }
   0x1   :  { %s36_s8 = smov 0  }
   0x2   :  { %18 = dma.general %s53_s0, 128, %s54_s1, %s34_s6, %s35_s7, [#allocation4], %s36_s8, 0  }
   0x3   :  { %32 = dma.done.wait [#allocation2], 128 }
   0x4   :  { %33 = vsyncadd [#allocation2], 4294967168 }
   0x5   :  { %22 = vsyncmov [#allocation2] }
   0x8   :  { %s23_s13 = vpop.sfrf %22 }
   0x9   :  { %p28_p0 = scmp.ne.s32.totalorder %s23_s13, 0 }
   0xb   :  { %27 = shalt.err (%p28_p0)  }

</bundles_post_ra>
